<compile_context>
chip_gen: v5e
topology: v5e:2x2
jax: 0.10.0
libtpu: 0.0.40
codegen_flags: <defaults>
</compile_context>

<pallas_src>
import jax
import jax.numpy as jnp
from jax.experimental import pallas as pl
from jax.experimental.pallas import tpu as pltpu

LANES = 128


def _round_up(n, m):
    return ((n + m - 1) // m) * m


def discriminator_kernel(w1_ref, b1_ref, w2_ref, b2_ref, x_ref, o_ref):
    # w1_ref: (21,) SMEM, row-major (out=3, in=7);  b1_ref: (3,) SMEM
    # w2_ref: (3,)  SMEM;                           b2_ref: (1,) SMEM
    # x_ref:  (7, tile_s, 128) f32 VMEM;            o_ref:  (tile_s, 128) f32 VMEM
    x = [x_ref[k] for k in range(7)]                 # seven dense (tile_s, 128) slabs

    # Layer 1: Linear(7, 3) + Sigmoid — unrolled VPU broadcast mul-adds.
    h = []
    for j in range(3):
        acc = x[0] * w1_ref[j * 7 + 0]
        for k in range(1, 7):
            acc = acc + x[k] * w1_ref[j * 7 + k]
        h.append(jax.nn.sigmoid(acc + b1_ref[j]))    # (tile_s, 128), exp on EUP

    # Layer 2: Linear(3, 1) + Sigmoid.
    y = h[0] * w2_ref[0] + h[1] * w2_ref[1] + h[2] * w2_ref[2] + b2_ref[0]
    o_ref[...] = jax.nn.sigmoid(y)                   # dense, unmasked full-width store


def discriminator_forward(x, w1, b1, w2, b2, *, tile_s=1024):
    """x: (B, 7) f32. w1: (3, 7), b1: (3,), w2: (1, 3), b2: (1,) — PyTorch layout.

    Returns (B, 1) f32, matching the torch module's output shape.
    """
    x = jnp.asarray(x, jnp.float32)
    B = x.shape[0]
    assert x.shape[1] == 7, "Discriminator expects 7 input features"

    # Pad batch only to the 128-lane multiple (not to a multiple of the tile).
    b_pad = _round_up(max(B, LANES), LANES)
    if b_pad != B:
        x = jnp.pad(x, ((0, b_pad - B), (0, 0)))
    S = b_pad // LANES

    # Feature-major, batch densified onto (sublane, lane): (7, S, 128).
    # The reshape after the transpose is contiguous (free).
    xfm = x.T.reshape(7, S, LANES)

    # Tile choice: ~128K batch elements per step; clamp to full extent for
    # small batches, keep a multiple of 8 sublanes otherwise.
    if S <= tile_s:
        tile_s = S
    else:
        tile_s = max(8, (tile_s // 8) * 8)

    # Flatten params (row-major) so the kernel reads scalars out of SMEM.
    w1_flat = jnp.asarray(w1, jnp.float32).reshape(-1)   # (21,)
    b1_flat = jnp.asarray(b1, jnp.float32).reshape(-1)   # (3,)
    w2_flat = jnp.asarray(w2, jnp.float32).reshape(-1)   # (3,)
    b2_flat = jnp.asarray(b2, jnp.float32).reshape(-1)   # (1,)

    smem = pl.BlockSpec(memory_space=pltpu.MemorySpace.SMEM)
    out = pl.pallas_call(
        discriminator_kernel,
        out_shape=jax.ShapeDtypeStruct((S, LANES), jnp.float32),
        grid=(pl.cdiv(S, tile_s),),
        in_specs=[smem, smem, smem, smem,
                  pl.BlockSpec((7, tile_s, LANES), lambda i: (0, i, 0))],
        out_specs=pl.BlockSpec((tile_s, LANES), lambda i: (i, 0)),
        compiler_params=pltpu.CompilerParams(
            dimension_semantics=("parallel",),
            vmem_limit_bytes=40 * 1024 * 1024,
        ),
    )(w1_flat, b1_flat, w2_flat, b2_flat, xfm)

    return out.reshape(b_pad)[:B].reshape(B, 1)


def _torch_like_linear_init(key, out_features, in_features):
    """Deterministic init mimicking torch.nn.Linear default (U(-k, k), k=1/sqrt(fan_in))."""
    kw, kb = jax.random.split(key)
    bound = 1.0 / jnp.sqrt(jnp.float32(in_features))
    w = jax.random.uniform(kw, (out_features, in_features), jnp.float32, -bound, bound)
    b = jax.random.uniform(kb, (out_features,), jnp.float32, -bound, bound)
    return w, b


def reference_forward(x, w1, b1, w2, b2):
    h = jax.nn.sigmoid(x @ w1.T + b1)
    return jax.nn.sigmoid(h @ w2.T + b2)


if __name__ == "__main__":
    key = jax.random.PRNGKey(0)
    k_in, k_in2, k_l1, k_l2 = jax.random.split(key, 4)

    # Deterministic parameter init (shapes from the module's __init__).
    w1, b1 = _torch_like_linear_init(k_l1, 3, 7)   # Linear(7, 3)
    w2, b2 = _torch_like_linear_init(k_l2, 1, 3)   # Linear(3, 1)

    # Small batch of inputs with 7 features each (what Linear(7, 3) implies).
    B = 8
    x = jax.random.normal(k_in, (B, 7), jnp.float32)
    out = jax.block_until_ready(discriminator_forward(x, w1, b1, w2, b2))
    ref = reference_forward(x, w1, b1, w2, b2)
    assert out.shape == (B, 1)
    assert jnp.allclose(out, ref, atol=1e-5, rtol=1e-5)

    # Second check: batch not a multiple of 128 (exercises the pad/slice path).
    B2 = 261
    x2 = jax.random.normal(k_in2, (B2, 7), jnp.float32)
    out2 = jax.block_until_ready(discriminator_forward(x2, w1, b1, w2, b2))
    ref2 = reference_forward(x2, w1, b1, w2, b2)
    assert out2.shape == (B2, 1)
    assert jnp.allclose(out2, ref2, atol=1e-5, rtol=1e-5)

    print("KERNEL_OK")
</pallas_src>

<mosaic_0001>
module attributes {stable_mosaic.version = 11 : i64} {
  func.func @discriminator_kernel(%arg0: i32, %arg1: memref<21xf32, #tpu.memory_space<smem>>, %arg2: memref<3xf32, #tpu.memory_space<smem>>, %arg3: memref<3xf32, #tpu.memory_space<smem>>, %arg4: memref<1xf32, #tpu.memory_space<smem>>, %arg5: memref<7x1x128xf32, #tpu.memory_space<vmem>>, %arg6: memref<1x128xf32, #tpu.memory_space<vmem>>) attributes {dimension_semantics = [#tpu.dimension_semantics<parallel>], iteration_bounds = array<i64: 1>, scalar_prefetch = 0 : i64, scratch_operands = 0 : i64, tpu.core_type = #tpu.core_type<tc>, window_params = [{transform_indices = @transform_0, window_bounds = array<i64: 21>}, {transform_indices = @transform_1, window_bounds = array<i64: 3>}, {transform_indices = @transform_2, window_bounds = array<i64: 3>}, {transform_indices = @transform_3, window_bounds = array<i64: 1>}, {transform_indices = @transform_4, window_bounds = array<i64: 7, 1, 128>}, {transform_indices = @transform_5, window_bounds = array<i64: 1, 128>}]} {
    %c0 = arith.constant 0 : index
    %c0_0 = arith.constant 0 : index
    %c0_1 = arith.constant 0 : index
    %0 = vector.load %arg5[%c0, %c0_0, %c0_1] : memref<7x1x128xf32, #tpu.memory_space<vmem>>, vector<1x1x128xf32>
    %1 = vector.shape_cast %0 : vector<1x1x128xf32> to vector<1x128xf32>
    %c1 = arith.constant 1 : index
    %c0_2 = arith.constant 0 : index
    %c0_3 = arith.constant 0 : index
    %2 = vector.load %arg5[%c1, %c0_2, %c0_3] : memref<7x1x128xf32, #tpu.memory_space<vmem>>, vector<1x1x128xf32>
    %3 = vector.shape_cast %2 : vector<1x1x128xf32> to vector<1x128xf32>
    %c2 = arith.constant 2 : index
    %c0_4 = arith.constant 0 : index
    %c0_5 = arith.constant 0 : index
    %4 = vector.load %arg5[%c2, %c0_4, %c0_5] : memref<7x1x128xf32, #tpu.memory_space<vmem>>, vector<1x1x128xf32>
    %5 = vector.shape_cast %4 : vector<1x1x128xf32> to vector<1x128xf32>
    %c3 = arith.constant 3 : index
    %c0_6 = arith.constant 0 : index
    %c0_7 = arith.constant 0 : index
    %6 = vector.load %arg5[%c3, %c0_6, %c0_7] : memref<7x1x128xf32, #tpu.memory_space<vmem>>, vector<1x1x128xf32>
    %7 = vector.shape_cast %6 : vector<1x1x128xf32> to vector<1x128xf32>
    %c4 = arith.constant 4 : index
    %c0_8 = arith.constant 0 : index
    %c0_9 = arith.constant 0 : index
    %8 = vector.load %arg5[%c4, %c0_8, %c0_9] : memref<7x1x128xf32, #tpu.memory_space<vmem>>, vector<1x1x128xf32>
    %9 = vector.shape_cast %8 : vector<1x1x128xf32> to vector<1x128xf32>
    %c5 = arith.constant 5 : index
    %c0_10 = arith.constant 0 : index
    %c0_11 = arith.constant 0 : index
    %10 = vector.load %arg5[%c5, %c0_10, %c0_11] : memref<7x1x128xf32, #tpu.memory_space<vmem>>, vector<1x1x128xf32>
    %11 = vector.shape_cast %10 : vector<1x1x128xf32> to vector<1x128xf32>
    %c6 = arith.constant 6 : index
    %c0_12 = arith.constant 0 : index
    %c0_13 = arith.constant 0 : index
    %12 = vector.load %arg5[%c6, %c0_12, %c0_13] : memref<7x1x128xf32, #tpu.memory_space<vmem>>, vector<1x1x128xf32>
    %13 = vector.shape_cast %12 : vector<1x1x128xf32> to vector<1x128xf32>
    %c0_14 = arith.constant 0 : index
    %14 = memref.load %arg1[%c0_14] : memref<21xf32, #tpu.memory_space<smem>>
    %15 = vector.broadcast %14 : f32 to vector<1x128xf32>
    %16 = arith.mulf %1, %15 : vector<1x128xf32>
    %c1_15 = arith.constant 1 : index
    %17 = memref.load %arg1[%c1_15] : memref<21xf32, #tpu.memory_space<smem>>
    %18 = vector.broadcast %17 : f32 to vector<1x128xf32>
    %19 = arith.mulf %3, %18 : vector<1x128xf32>
    %20 = arith.addf %16, %19 : vector<1x128xf32>
    %c2_16 = arith.constant 2 : index
    %21 = memref.load %arg1[%c2_16] : memref<21xf32, #tpu.memory_space<smem>>
    %22 = vector.broadcast %21 : f32 to vector<1x128xf32>
    %23 = arith.mulf %5, %22 : vector<1x128xf32>
    %24 = arith.addf %20, %23 : vector<1x128xf32>
    %c3_17 = arith.constant 3 : index
    %25 = memref.load %arg1[%c3_17] : memref<21xf32, #tpu.memory_space<smem>>
    %26 = vector.broadcast %25 : f32 to vector<1x128xf32>
    %27 = arith.mulf %7, %26 : vector<1x128xf32>
    %28 = arith.addf %24, %27 : vector<1x128xf32>
    %c4_18 = arith.constant 4 : index
    %29 = memref.load %arg1[%c4_18] : memref<21xf32, #tpu.memory_space<smem>>
    %30 = vector.broadcast %29 : f32 to vector<1x128xf32>
    %31 = arith.mulf %9, %30 : vector<1x128xf32>
    %32 = arith.addf %28, %31 : vector<1x128xf32>
    %c5_19 = arith.constant 5 : index
    %33 = memref.load %arg1[%c5_19] : memref<21xf32, #tpu.memory_space<smem>>
    %34 = vector.broadcast %33 : f32 to vector<1x128xf32>
    %35 = arith.mulf %11, %34 : vector<1x128xf32>
    %36 = arith.addf %32, %35 : vector<1x128xf32>
    %c6_20 = arith.constant 6 : index
    %37 = memref.load %arg1[%c6_20] : memref<21xf32, #tpu.memory_space<smem>>
    %38 = vector.broadcast %37 : f32 to vector<1x128xf32>
    %39 = arith.mulf %13, %38 : vector<1x128xf32>
    %40 = arith.addf %36, %39 : vector<1x128xf32>
    %c0_21 = arith.constant 0 : index
    %41 = memref.load %arg2[%c0_21] : memref<3xf32, #tpu.memory_space<smem>>
    %42 = vector.broadcast %41 : f32 to vector<1x128xf32>
    %43 = arith.addf %40, %42 : vector<1x128xf32>
    %44 = arith.negf %43 : vector<1x128xf32>
    %45 = math.exp %44 : vector<1x128xf32>
    %cst = arith.constant 1.000000e+00 : f32
    %46 = vector.broadcast %cst : f32 to vector<1x128xf32>
    %47 = arith.addf %46, %45 : vector<1x128xf32>
    %48 = arith.divf %46, %47 : vector<1x128xf32>
    %c7 = arith.constant 7 : index
    %49 = memref.load %arg1[%c7] : memref<21xf32, #tpu.memory_space<smem>>
    %50 = vector.broadcast %49 : f32 to vector<1x128xf32>
    %51 = arith.mulf %1, %50 : vector<1x128xf32>
    %c8 = arith.constant 8 : index
    %52 = memref.load %arg1[%c8] : memref<21xf32, #tpu.memory_space<smem>>
    %53 = vector.broadcast %52 : f32 to vector<1x128xf32>
    %54 = arith.mulf %3, %53 : vector<1x128xf32>
    %55 = arith.addf %51, %54 : vector<1x128xf32>
    %c9 = arith.constant 9 : index
    %56 = memref.load %arg1[%c9] : memref<21xf32, #tpu.memory_space<smem>>
    %57 = vector.broadcast %56 : f32 to vector<1x128xf32>
    %58 = arith.mulf %5, %57 : vector<1x128xf32>
    %59 = arith.addf %55, %58 : vector<1x128xf32>
    %c10 = arith.constant 10 : index
    %60 = memref.load %arg1[%c10] : memref<21xf32, #tpu.memory_space<smem>>
    %61 = vector.broadcast %60 : f32 to vector<1x128xf32>
    %62 = arith.mulf %7, %61 : vector<1x128xf32>
    %63 = arith.addf %59, %62 : vector<1x128xf32>
    %c11 = arith.constant 11 : index
    %64 = memref.load %arg1[%c11] : memref<21xf32, #tpu.memory_space<smem>>
    %65 = vector.broadcast %64 : f32 to vector<1x128xf32>
    %66 = arith.mulf %9, %65 : vector<1x128xf32>
    %67 = arith.addf %63, %66 : vector<1x128xf32>
    %c12 = arith.constant 12 : index
    %68 = memref.load %arg1[%c12] : memref<21xf32, #tpu.memory_space<smem>>
    %69 = vector.broadcast %68 : f32 to vector<1x128xf32>
    %70 = arith.mulf %11, %69 : vector<1x128xf32>
    %71 = arith.addf %67, %70 : vector<1x128xf32>
    %c13 = arith.constant 13 : index
    %72 = memref.load %arg1[%c13] : memref<21xf32, #tpu.memory_space<smem>>
    %73 = vector.broadcast %72 : f32 to vector<1x128xf32>
    %74 = arith.mulf %13, %73 : vector<1x128xf32>
    %75 = arith.addf %71, %74 : vector<1x128xf32>
    %c1_22 = arith.constant 1 : index
    %76 = memref.load %arg2[%c1_22] : memref<3xf32, #tpu.memory_space<smem>>
    %77 = vector.broadcast %76 : f32 to vector<1x128xf32>
    %78 = arith.addf %75, %77 : vector<1x128xf32>
    %79 = arith.negf %78 : vector<1x128xf32>
    %80 = math.exp %79 : vector<1x128xf32>
    %cst_23 = arith.constant 1.000000e+00 : f32
    %81 = vector.broadcast %cst_23 : f32 to vector<1x128xf32>
    %82 = arith.addf %81, %80 : vector<1x128xf32>
    %83 = arith.divf %81, %82 : vector<1x128xf32>
    %c14 = arith.constant 14 : index
    %84 = memref.load %arg1[%c14] : memref<21xf32, #tpu.memory_space<smem>>
    %85 = vector.broadcast %84 : f32 to vector<1x128xf32>
    %86 = arith.mulf %1, %85 : vector<1x128xf32>
    %c15 = arith.constant 15 : index
    %87 = memref.load %arg1[%c15] : memref<21xf32, #tpu.memory_space<smem>>
    %88 = vector.broadcast %87 : f32 to vector<1x128xf32>
    %89 = arith.mulf %3, %88 : vector<1x128xf32>
    %90 = arith.addf %86, %89 : vector<1x128xf32>
    %c16 = arith.constant 16 : index
    %91 = memref.load %arg1[%c16] : memref<21xf32, #tpu.memory_space<smem>>
    %92 = vector.broadcast %91 : f32 to vector<1x128xf32>
    %93 = arith.mulf %5, %92 : vector<1x128xf32>
    %94 = arith.addf %90, %93 : vector<1x128xf32>
    %c17 = arith.constant 17 : index
    %95 = memref.load %arg1[%c17] : memref<21xf32, #tpu.memory_space<smem>>
    %96 = vector.broadcast %95 : f32 to vector<1x128xf32>
    %97 = arith.mulf %7, %96 : vector<1x128xf32>
    %98 = arith.addf %94, %97 : vector<1x128xf32>
    %c18 = arith.constant 18 : index
    %99 = memref.load %arg1[%c18] : memref<21xf32, #tpu.memory_space<smem>>
    %100 = vector.broadcast %99 : f32 to vector<1x128xf32>
    %101 = arith.mulf %9, %100 : vector<1x128xf32>
    %102 = arith.addf %98, %101 : vector<1x128xf32>
    %c19 = arith.constant 19 : index
    %103 = memref.load %arg1[%c19] : memref<21xf32, #tpu.memory_space<smem>>
    %104 = vector.broadcast %103 : f32 to vector<1x128xf32>
    %105 = arith.mulf %11, %104 : vector<1x128xf32>
    %106 = arith.addf %102, %105 : vector<1x128xf32>
    %c20 = arith.constant 20 : index
    %107 = memref.load %arg1[%c20] : memref<21xf32, #tpu.memory_space<smem>>
    %108 = vector.broadcast %107 : f32 to vector<1x128xf32>
    %109 = arith.mulf %13, %108 : vector<1x128xf32>
    %110 = arith.addf %106, %109 : vector<1x128xf32>
    %c2_24 = arith.constant 2 : index
    %111 = memref.load %arg2[%c2_24] : memref<3xf32, #tpu.memory_space<smem>>
    %112 = vector.broadcast %111 : f32 to vector<1x128xf32>
    %113 = arith.addf %110, %112 : vector<1x128xf32>
    %114 = arith.negf %113 : vector<1x128xf32>
    %115 = math.exp %114 : vector<1x128xf32>
    %cst_25 = arith.constant 1.000000e+00 : f32
    %116 = vector.broadcast %cst_25 : f32 to vector<1x128xf32>
    %117 = arith.addf %116, %115 : vector<1x128xf32>
    %118 = arith.divf %116, %117 : vector<1x128xf32>
    %c0_26 = arith.constant 0 : index
    %119 = memref.load %arg3[%c0_26] : memref<3xf32, #tpu.memory_space<smem>>
    %120 = vector.broadcast %119 : f32 to vector<1x128xf32>
    %121 = arith.mulf %48, %120 : vector<1x128xf32>
    %c1_27 = arith.constant 1 : index
    %122 = memref.load %arg3[%c1_27] : memref<3xf32, #tpu.memory_space<smem>>
    %123 = vector.broadcast %122 : f32 to vector<1x128xf32>
    %124 = arith.mulf %83, %123 : vector<1x128xf32>
    %125 = arith.addf %121, %124 : vector<1x128xf32>
    %c2_28 = arith.constant 2 : index
    %126 = memref.load %arg3[%c2_28] : memref<3xf32, #tpu.memory_space<smem>>
    %127 = vector.broadcast %126 : f32 to vector<1x128xf32>
    %128 = arith.mulf %118, %127 : vector<1x128xf32>
    %129 = arith.addf %125, %128 : vector<1x128xf32>
    %c0_29 = arith.constant 0 : index
    %130 = memref.load %arg4[%c0_29] : memref<1xf32, #tpu.memory_space<smem>>
    %131 = vector.broadcast %130 : f32 to vector<1x128xf32>
    %132 = arith.addf %129, %131 : vector<1x128xf32>
    %133 = arith.negf %132 : vector<1x128xf32>
    %134 = math.exp %133 : vector<1x128xf32>
    %cst_30 = arith.constant 1.000000e+00 : f32
    %135 = vector.broadcast %cst_30 : f32 to vector<1x128xf32>
    %136 = arith.addf %135, %134 : vector<1x128xf32>
    %137 = arith.divf %135, %136 : vector<1x128xf32>
    %c0_31 = arith.constant 0 : index
    %c0_32 = arith.constant 0 : index
    %138 = vector.load %arg6[%c0_31, %c0_32] : memref<1x128xf32, #tpu.memory_space<vmem>>, vector<1x128xf32>
    tpu.vector_store %arg6[%c0_31, %c0_32], %137 {strides = array<i32>} : memref<1x128xf32, #tpu.memory_space<vmem>>, vector<1x128xf32>,
    return
  }
  func.func @transform_0(%arg0: i32) -> i32 {
    %c0_i32 = arith.constant 0 : i32
    %c0_i32_0 = arith.constant 0 : i32
    return %c0_i32 : i32
  }
  func.func @transform_1(%arg0: i32) -> i32 {
    %c0_i32 = arith.constant 0 : i32
    %c0_i32_0 = arith.constant 0 : i32
    return %c0_i32 : i32
  }
  func.func @transform_2(%arg0: i32) -> i32 {
    %c0_i32 = arith.constant 0 : i32
    %c0_i32_0 = arith.constant 0 : i32
    return %c0_i32 : i32
  }
  func.func @transform_3(%arg0: i32) -> i32 {
    %c0_i32 = arith.constant 0 : i32
    %c0_i32_0 = arith.constant 0 : i32
    return %c0_i32 : i32
  }
  func.func @transform_4(%arg0: i32) -> (i32, i32, i32) {
    %c0_i32 = arith.constant 0 : i32
    %c0_i32_0 = arith.constant 0 : i32
    %c0_i32_1 = arith.constant 0 : i32
    return %c0_i32, %arg0, %c0_i32_0 : i32, i32, i32
  }
  func.func @transform_5(%arg0: i32) -> (i32, i32) {
    %c0_i32 = arith.constant 0 : i32
    %c0_i32_0 = arith.constant 0 : i32
    return %arg0, %c0_i32 : i32, i32
  }
}

</mosaic_0001>

<bundles_post_ra>
// kernel: tpu_custom_call.1
= control target key start
LH: loop header
LB: loop body
LE: loop exit
PB: predicated region body
PF: predicated region fallthrough
CT: control target
= control target key end

     0   :  { %11 = vsyncpa [#allocation6], 0  ;;  %s538_s0 = inlined_call_operand.vmem [shape: f32[21], index: 0, kind: input, shape index: {}]   ;;  %s539_s1 = inlined_call_operand.vmem [shape: f32[3], index: 1, kind: input, shape index: {}]   ;;  %s540_s2 = inlined_call_operand.vmem [shape: f32[3], index: 2, kind: input, shape index: {}]   ;;  %s541_s3 = inlined_call_operand.<no memory space> [shape: f32[1], index: 3, kind: input, shape index: {}]   ;;  %s542_s4 = inlined_call_operand.hbm [shape: f32[7,1,128], index: 4, kind: input, shape index: {}]   ;;  %s543_s5 = inlined_call_operand.hbm [shape: f32[1,128], index: 5, kind: output, shape index: {}]  }
   0x1   :  { %12 = vsyncpa [#allocation8], 0 }
   0x2   :  { %13 = vsyncpa [#allocation4], 0  ;;  %s29_s20 = sshll.u32 %s539_s1, 4  ;;  %s30_s20 = int_to_ptr.vmem [resolvable:$true] %s29_s20 }
   0x3   :  { %14 = vsyncpa [#allocation5], 0  ;;  %s20_s23 = sshll.u32 %s538_s0, 4  ;;  %s430_s24 = smov [#allocation7]   ;;  %s21_s23 = int_to_ptr.vmem [resolvable:$true] %s20_s23 }
   0x4   :  { %32 = dma.vmem_to_smem %s30_s20, 16, %s430_s24, [#allocation8]  }
   0x5   :  { %s431_s25 = smov [#allocation3]   ;;  %s38_s28 = sshll.u32 %s540_s2, 4  ;;  %s39_s28 = int_to_ptr.vmem [resolvable:$true] %s38_s28 }
   0x6   :  { %23 = dma.vmem_to_smem %s21_s23, 16, %s431_s25, [#allocation6]  }
   0x7   :  { %s48_s1 = sshll.u32 %s542_s4, 4  ;;  %s432_s6 = smov [#allocation9]   ;;  %s49_s1 = int_to_ptr.hbm [resolvable:$true] %s48_s1 }
   0x8   :  { %41 = dma.vmem_to_smem %s39_s28, 16, %s432_s6, [#allocation8]  }
   0x9   :  { %s433_s7 = smov [#allocation10]   ;;  %s434_s0 = smov 16  }
   0xa   :  { %s50_s8 = sshll.u32 %s433_s7, 4  ;;  %s435_s9 = smov 1   ;;  %s51_s8 = int_to_ptr.vmem [resolvable:$true] %s50_s8 }
   0xb   :  { %56 = dma.hbm_to_vmem [thread:$0]  %s49_s1, 112, %s51_s8, [#allocation4], %s434_s0, %s434_s0, %s435_s9  }
   0xc   :  { %422 = dma.done.wait [#allocation6], 16  }
   0xd   :  { %423 = vsyncadd [#allocation6], 4294967280 }
   0xe   :  { %424 = dma.done.wait [#allocation8], 32  }
   0xf   :  { %425 = vsyncadd [#allocation8], 4294967264 }
  0x10   :  { %426 = dma.done.wait [#allocation4], 112  }
  0x11   :  { %427 = vsyncadd [#allocation4], 4294967184 }
  0x12   :  { %73 = sfence }
  0x13   :  { %s87_s2 = sld [smem:[#allocation3]]  ;;  %v479_v0 = vld [vmem:[#allocation10] sm:$0x1]  ;;  %v481_v1 = vld [vmem:[#allocation10 + $0x1] sm:$0x1] }
  0x14   :  { %s287_s10 = sld [smem:[#allocation3 + $0x1]]  ;;  %v483_v2 = vld [vmem:[#allocation10 + $0x2] sm:$0x1]  ;;  %v487_v4 = vld [vmem:[#allocation10 + $0x3] sm:$0x1] }
  0x15   :  { %s288_s11 = sld [smem:[#allocation3 + $0x2]]  ;;  %v493_v9 = vld [vmem:[#allocation10 + $0x4] sm:$0x1]  ;;  %v497_v15 = vld [vmem:[#allocation10 + $0x5] sm:$0x1] }
  0x16   :  { %s289_s4 = sld [smem:[#allocation3 + $0x3]]  ;;  %v500_v19 = vld [vmem:[#allocation10 + $0x6] sm:$0x1] }
  0x17   :  { %s290_s12 = sld [smem:[#allocation3 + $0x4]] }
  0x18   :  { %s291_s13 = sld [smem:[#allocation3 + $0x5]] }
  0x19   :  { %v88_v3 = vstv %s87_s2  ;;  %s485_s14 = sld [smem:[#allocation3 + $0x6]]  ;;  %s436_s2 = smov [#allocation11]  }
  0x1a   :  { %v89_v5 = vmul.f32 %v88_v3, %v479_v0  ;;  %v91_v6 = vstv %s287_s10  ;;  %s490_s15 = sld [smem:[#allocation7]]  ;;  %s273_s10 = sshll.u32 %s436_s2, 4  ;;  %s274_s10 = int_to_ptr.vmem [resolvable:$true] %s273_s10 }
  0x1b   :  { %v92_v7 = vmul.f32 %v91_v6, %v481_v1  ;;  %v95_v8 = vstv %s288_s11  ;;  %s294_s16 = sld [smem:[#allocation3 + $0x7]] }
  0x1c   :  { %v96_v10 = vmul.f32 %v95_v8, %v483_v2  ;;  %v99_v11 = vstv %s289_s4  ;;  %s295_s17 = sld [smem:[#allocation3 + $0x8]]  ;;  %s275_s4 = sshll.u32 %s543_s5, 4  ;;  %s276_s4 = int_to_ptr.hbm [resolvable:$true] %s275_s4 }
  0x1d   :  { %v93_v12 = vadd.f32 %v92_v7, %v89_v5  ;;  %v100_v13 = vmul.f32 %v99_v11, %v487_v4  ;;  %v103_v14 = vstv %s290_s12  ;;  %s296_s18 = sld [smem:[#allocation3 + $0x9]] }
  0x1e   :  { %v107_v16 = vstv %s291_s13  ;;  %s297_s19 = sld [smem:[#allocation3 + $0xa]]  ;;  %v104_v18 = vmul.f32 %v103_v14, %v493_v9 }
  0x1f   :  { %v97_v17 = vadd.f32 %v96_v10, %v93_v12  ;;  %s298_s20 = sld [smem:[#allocation3 + $0xb]]  ;;  %v111_v20 = vstv %s485_s14  ;;  %v108_v22 = vmul.f32 %v107_v16, %v497_v15 }
  0x20   :  { %s503_s21 = sld [smem:[#allocation3 + $0xc]]  ;;  %v112_v27 = vmul.f32 %v111_v20, %v500_v19  ;;  %v115_v36 = vstv %s490_s15 }
  0x21   :  { %v101_v21 = vadd.f32 %v100_v13, %v97_v17  ;;  %v137_v23 = vstv %s294_s16  ;;  %s506_s22 = sld [smem:[#allocation3 + $0xd]] }
  0x22   :  { %v138_v24 = vmul.f32 %v137_v23, %v479_v0  ;;  %v140_v25 = vstv %s295_s17  ;;  %s509_s23 = sld [smem:[#allocation7 + $0x1]] }
  0x23   :  { %v105_v26 = vadd.f32 %v104_v18, %v101_v21  ;;  %v141_v28 = vmul.f32 %v140_v25, %v481_v1  ;;  %v144_v29 = vstv %s296_s18  ;;  %s303_s24 = sld [smem:[#allocation3 + $0xe]] }
  0x24   :  { %v145_v30 = vmul.f32 %v144_v29, %v483_v2  ;;  %v148_v31 = vstv %s297_s19  ;;  %s304_s25 = sld [smem:[#allocation3 + $0xf]] }
  0x25   :  { %v109_v32 = vadd.f32 %v108_v22, %v105_v26  ;;  %v142_v33 = vadd.f32 %v141_v28, %v138_v24  ;;  %v149_v34 = vmul.f32 %v148_v31, %v487_v4  ;;  %v152_v35 = vstv %s298_s20  ;;  %s305_s26 = sld [smem:[#allocation3 + $0x10]] }
  0x26   :  { %v156_v37 = vstv %s503_s21  ;;  %s306_s27 = sld [smem:[#allocation3 + $0x11]]  ;;  %v153_v40 = vmul.f32 %v152_v35, %v493_v9 }
  0x27   :  { %v113_v38 = vadd.f32 %v112_v27, %v109_v32  ;;  %v146_v39 = vadd.f32 %v145_v30, %v142_v33  ;;  %v160_v41 = vstv %s506_s22  ;;  %s307_s28 = sld [smem:[#allocation3 + $0x12]]  ;;  %v157_v44 = vmul.f32 %v156_v37, %v497_v15 }
  0x28   :  { %s308_s29 = sld [smem:[#allocation3 + $0x13]]  ;;  %v161_v46 = vmul.f32 %v160_v41, %v500_v19  ;;  %v164_v58 = vstv %s509_s23 }
  0x29   :  { %v116_v42 = vadd.f32 %v115_v36, %v113_v38  ;;  %v150_v43 = vadd.f32 %v149_v34, %v146_v39  ;;  %v186_v45 = vstv %s303_s24  ;;  %s309_s30 = sld [smem:[#allocation3 + $0x14]] }
  0x2a   :  { %v187_v47 = vmul.f32 %v186_v45, %v479_v0  ;;  %v189_v48 = vstv %s304_s25  ;;  %s310_s1 = sld [smem:[#allocation7 + $0x2]] }
  0x2b   :  { %v293_v49 = vmul.f32 -1.442695, %v116_v42  ;;  %v154_v50 = vadd.f32 %v153_v40, %v150_v43  ;;  %v190_v51 = vmul.f32 %v189_v48, %v481_v1  ;;  %v193_v52 = vstv %s305_s26  ;;  %s529_s6 = sld [smem:[#allocation9]] }
  0x2c   :  { %v194_v53 = vmul.f32 %v193_v52, %v483_v2  ;;  %v197_v54 = vstv %s306_s27  ;;  %s312_s7 = sld [smem:[#allocation9 + $0x1]] }
  0x2d   :  { %322 = vpow2.f32 %v293_v49  ;;  %v158_v55 = vadd.f32 %v157_v44, %v154_v50  ;;  %v191_v56 = vadd.f32 %v190_v51, %v187_v47  ;;  %v198_v57 = vmul.f32 %v197_v54, %v487_v4  ;;  %s313_s8 = sld [smem:[#allocation9 + $0x2]] }
  0x2e   :  { %v201_v59 = vstv %s307_s28  ;;  %v205_v60 = vstv %s308_s29 }
  0x2f   :  { %v162_v61 = vadd.f32 %v161_v46, %v158_v55  ;;  %v195_v62 = vadd.f32 %v194_v53, %v191_v56  ;;  %v202_v63 = vmul.f32 %v201_v59, %v493_v9  ;;  %v209_v0 = vstv %s309_s30 }
  0x30   :  { %v206_v5 = vmul.f32 %v205_v60, %v497_v15  ;;  %v210_v8 = vmul.f32 %v209_v0, %v500_v19  ;;  %v213_v11 = vstv %s310_s1  ;;  %v246_v55 = vstv %s541_s3 }
  0x31   :  { %v165_v3 = vadd.f32 %v164_v58, %v162_v61  ;;  %v199_v1 = vadd.f32 %v198_v57, %v195_v62  ;;  %v235_v38 = vstv %s529_s6 }
  0x32   :  { %v238_v42 = vstv %s312_s7 }
  0x33   :  { %v323_v2 = vpop.eup %322  ;;  %v302_v6 = vmul.f32 -1.442695, %v165_v3  ;;  %v203_v7 = vadd.f32 %v202_v63, %v199_v1  ;;  %v242_v50 = vstv %s313_s8 }
  0x34   :  { %v120_v10 = vadd.f32 1.0, %v323_v2 }
  0x35   :  { %324 = vpow2.f32 %v302_v6  ;;  %v207_v4 = vadd.f32 %v206_v5, %v203_v7 }
  0x36   :  { %326 = vrcp.f32 %v120_v10  ;;  %vm126_vm0 = vweird.f32 %v120_v10  ;;  %v130_v19 = vand.u32 2147483647, %v120_v10  ;;  %v132_v25 = vand.u32 2147483648, %v120_v10 }
  0x37   :  { %v211_v12 = vadd.f32 %v210_v8, %v207_v4 }
  0x38   :  { %v133_v31 = vor.u32 1.1754944e-38, %v132_v25  ;;  %vm131_vm6 = vcmp.eq.f32.partialorder %v130_v19, 8.507059e+37 }
  0x39   :  { %v214_v13 = vadd.f32 %v213_v11, %v211_v12 }
  0x3b   :  { %v325_v14 = vpop.eup %324  ;;  %v311_v16 = vmul.f32 -1.442695, %v214_v13 }
  0x3c   :  { %v327_v9 = vpop.eup %326  ;;  %v169_v17 = vadd.f32 1.0, %v325_v14 }
  0x3d   :  { %v122_v18 = vmul.f32 %v327_v9, %v120_v10  ;;  %328 = vpow2.f32 %v311_v16  ;;  %vm127_vm1 = vweird.f32 %v327_v9 }
  0x3e   :  { %330 = vrcp.f32 %v169_v17  ;;  %vm175_vm2 = vweird.f32 %v169_v17  ;;  %v181_v26 = vand.u32 2147483648, %v169_v17  ;;  %v179_v29 = vand.u32 2147483647, %v169_v17  ;;  %vm128_vm4 = vmor %vm126_vm0, %vm127_vm1 }
  0x3f   :  { %v123_v15 = vsub.f32 1.0, %v122_v18 }
  0x40   :  { %v182_v32 = vor.u32 1.1754944e-38, %v181_v26  ;;  %vm180_vm7 = vcmp.eq.f32.partialorder %v179_v29, 8.507059e+37 }
  0x41   :  { %v124_v21 = vmul.f32 %v327_v9, %v123_v15 }
  0x43   :  { %v329_v20 = vpop.eup %328  ;;  %v125_v27 = vadd.f32 %v327_v9, %v124_v21 }
  0x44   :  { %v331_v22 = vpop.eup %330  ;;  %v218_v23 = vadd.f32 1.0, %v329_v20 }
  0x45   :  { %v171_v24 = vmul.f32 %v331_v22, %v169_v17  ;;  %vm176_vm3 = vweird.f32 %v331_v22  ;;  %v129_v33 = vsel %vm128_vm4, %v327_v9, %v125_v27 }
  0x46   :  { %332 = vrcp.f32 %v218_v23  ;;  %vm177_vm5 = vmor %vm175_vm2, %vm176_vm3  ;;  %v134_v39 = vsel %vm131_vm6, %v133_v31, %v129_v33  ;;  %v230_v41 = vand.u32 2147483648, %v218_v23  ;;  %vm224_vm8 = vweird.f32 %v218_v23 }
  0x47   :  { %v172_v28 = vsub.f32 1.0, %v171_v24  ;;  %v228_v44 = vand.u32 2147483647, %v218_v23  ;;  %v236_v46 = vmul.f32 %v235_v38, %v134_v39 }
  0x48   :  { %v231_v48 = vor.u32 1.1754944e-38, %v230_v41 }
  0x49   :  { %v173_v30 = vmul.f32 %v331_v22, %v172_v28  ;;  %vm229_vm11 = vcmp.eq.f32.partialorder %v228_v44, 8.507059e+37 }
  0x4b   :  { %v174_v34 = vadd.f32 %v331_v22, %v173_v30 }
  0x4c   :  { %v333_v35 = vpop.eup %332 }
  0x4d   :  { %v178_v36 = vsel %vm177_vm5, %v331_v22, %v174_v34  ;;  %v220_v37 = vmul.f32 %v333_v35, %v218_v23  ;;  %vm225_vm9 = vweird.f32 %v333_v35 }
  0x4e   :  { %v183_v40 = vsel %vm180_vm7, %v182_v32, %v178_v36  ;;  %vm226_vm10 = vmor %vm224_vm8, %vm225_vm9 }
  0x4f   :  { %v221_v43 = vsub.f32 1.0, %v220_v37  ;;  %v239_v47 = vmul.f32 %v238_v42, %v183_v40 }
  0x51   :  { %v222_v45 = vmul.f32 %v333_v35, %v221_v43  ;;  %v240_v52 = vadd.f32 %v239_v47, %v236_v46 }
  0x53   :  { %v223_v49 = vadd.f32 %v333_v35, %v222_v45 }
  0x55   :  { %v227_v51 = vsel %vm226_vm10, %v333_v35, %v223_v49 }
  0x56   :  { %v232_v53 = vsel %vm229_vm11, %v231_v48, %v227_v51 }
  0x57   :  { %v243_v54 = vmul.f32 %v242_v50, %v232_v53 }
  0x59   :  { %v244_v56 = vadd.f32 %v243_v54, %v240_v52 }
  0x5b   :  { %v247_v57 = vadd.f32 %v246_v55, %v244_v56 }
  0x5d   :  { %v314_v58 = vmul.f32 -1.442695, %v247_v57 }
  0x5f   :  { %334 = vpow2.f32 %v314_v58 }
  0x65   :  { %v335_v59 = vpop.eup %334 }
  0x66   :  { %v251_v60 = vadd.f32 1.0, %v335_v59 }
  0x68   :  { %336 = vrcp.f32 %v251_v60  ;;  %v263_v63 = vand.u32 2147483648, %v251_v60  ;;  %vm257_vm12 = vweird.f32 %v251_v60  ;;  %v261_v3 = vand.u32 2147483647, %v251_v60 }
  0x6a   :  { %v264_v5 = vor.u32 1.1754944e-38, %v263_v63  ;;  %vm262_vm15 = vcmp.eq.f32.partialorder %v261_v3, 8.507059e+37 }
  0x6e   :  { %v337_v61 = vpop.eup %336 }
  0x6f   :  { %v253_v62 = vmul.f32 %v337_v61, %v251_v60  ;;  %vm258_vm13 = vweird.f32 %v337_v61 }
  0x70   :  { %vm259_vm14 = vmor %vm257_vm12, %vm258_vm13 }
  0x71   :  { %v254_v0 = vsub.f32 1.0, %v253_v62 }
  0x73   :  { %v255_v1 = vmul.f32 %v337_v61, %v254_v0 }
  0x75   :  { %v256_v2 = vadd.f32 %v337_v61, %v255_v1 }
  0x77   :  { %v260_v6 = vsel %vm259_vm14, %v337_v61, %v256_v2 }
  0x78   :  { %v265_v7 = vsel %vm262_vm15, %v264_v5, %v260_v6 }
  0x79   :  { %267 = vst [vmem:[#allocation11] sm:$0x1] %v265_v7 }
  0x7a   :  { %278 = dma.vmem_to_hbm [thread:$0]  %s274_s10, 16, %s276_s4, [#allocation5]  }
  0x7b   :  { %428 = dma.done.wait [#allocation5], 16  }
  0x7c   :  { %429 = vsyncadd [#allocation5], 4294967280 }
  0x7d   :  { %283 = vsyncpa [#allocation4], 1 }
  0x7e   :  { %284 = vsyncpa [#allocation5], 1 }
  0x7f   :  { %285 = vsyncpa [#allocation6], 1 }
  0x80   :  { %286 = vsyncpa [#allocation8], 1 }

</bundles_post_ra>
